<compile_context>
chip_gen: v5e
topology: v5e:2x2
jax: 0.10.0
libtpu: 0.0.40
codegen_flags: <defaults>
</compile_context>

<pallas_src>
import jax
import jax.numpy as jnp
from jax.experimental import pallas as pl
from jax.experimental.pallas import tpu as pltpu


# ----------------------------------------------------------------------------
# Kernels
# ----------------------------------------------------------------------------
def _att_sum_kernel_direct(x_ref, o_ref):
    """f32 output: accumulate straight into the resident output block."""
    k = pl.program_id(1)

    @pl.when(k == 0)
    def _init():
        o_ref[...] = jnp.zeros_like(o_ref)

    # softmax over the size-1 projection dim == 1 exactly, so the module is a
    # pure reduction over the sequence axis.  dtype=f32 fuses the upcast into
    # the reduction (no full-tile f32 temporary).
    o_ref[...] += jnp.sum(x_ref[...], axis=1, dtype=jnp.float32)


def _att_sum_kernel_acc(x_ref, o_ref, acc_ref):
    """Low-precision output: accumulate in f32 scratch, cast once at the end."""
    k = pl.program_id(1)

    @pl.when(k == 0)
    def _init():
        acc_ref[...] = jnp.zeros_like(acc_ref)

    acc_ref[...] += jnp.sum(x_ref[...], axis=1, dtype=jnp.float32)

    @pl.when(k == pl.num_programs(1) - 1)
    def _finalize():
        o_ref[...] = acc_ref[...].astype(o_ref.dtype)


# ----------------------------------------------------------------------------
# Tile / generation selection
# ----------------------------------------------------------------------------
def _sublane_pack(dtype):
    # Sub-32-bit dtypes pack along sublanes: f32 -> 8 rows, bf16 -> 16, int8 -> 32.
    return max(8, 32 // max(1, jnp.dtype(dtype).itemsize))


def _legal_tiles(dim, pack):
    # Legal block sizes along a second-to-last-style axis: multiples of `pack`
    # that divide `dim`, plus the full dimension itself (always legal).
    tiles = {dim}
    if dim % pack == 0:
        tiles.update(t for t in range(pack, dim + 1, pack) if dim % t == 0)
    return sorted(tiles)


def _choose_tiles(B, N, D, dtype, target_block_bytes, want_parallel_split):
    """Pick (TB, TN) for the (TB, TN, D) input block so TB*TN*D*itemsize stays
    within target_block_bytes (modulo divisibility / legality constraints)."""
    itemsize = jnp.dtype(dtype).itemsize
    pack = _sublane_pack(dtype)
    row_budget = max(pack, target_block_bytes // max(1, D * itemsize))

    b_tiles = _legal_tiles(B, pack)
    n_tiles = _legal_tiles(N, pack)

    if want_parallel_split:
        # Multi-TensorCore chip: keep >= 2 grid steps on the "parallel" batch
        # axis so both cores get work; smallest legal batch tile that does so.
        split = [t for t in b_tiles if B // t >= 2]
        tb = min(split) if split else min(b_tiles)
        fit_n = [t for t in n_tiles if tb * t <= row_budget]
        tn = max(fit_n) if fit_n else min(n_tiles)
    else:
        # Single TensorCore: fill the budget with the sequence axis first,
        # then grow the batch tile into whatever budget remains.
        fit_n = [t for t in n_tiles if min(b_tiles) * t <= row_budget]
        tn = max(fit_n) if fit_n else min(n_tiles)
        fit_b = [t for t in b_tiles if t * tn <= row_budget]
        tb = max(fit_b) if fit_b else min(b_tiles)
    return tb, tn


def _generation_params():
    """Return (target_block_bytes, vmem_ceiling_bytes, want_parallel_split)."""
    kind = ""
    try:
        kind = (jax.devices()[0].device_kind or "").lower()
    except Exception:
        pass

    if "v7" in kind or "7x" in kind:
        gen = "v7x"
    elif "v6" in kind:
        gen = "v6e"
    elif "v5e" in kind or "v5 lite" in kind or "v5lite" in kind:
        gen = "v5e"
    elif "v5" in kind:
        gen = "v5p"
    elif "v4" in kind:
        gen = "v4"
    elif "v3" in kind or "v2" in kind:
        gen = "v3"
    else:
        gen = "unknown"

    table = {
        #          target block   vmem ceiling   need >=2 parallel batch steps
        "v7x":     (14 << 20,     48 << 20,      True),   # 64 MiB VMEM, 2 TC/chip
        "v6e":     (12 << 20,     96 << 20,      False),  # 128 MiB VMEM, 1 TC
        "v5e":     (6 << 20,      64 << 20,      False),  # 128 MiB VMEM, 1 TC
        "v5p":     (12 << 20,     96 << 20,      True),   # megacore
        "v4":      (12 << 20,     96 << 20,      True),   # megacore
        "v3":      (2 << 20,      12 << 20,      True),   # small VMEM
        "unknown": (6 << 20,      48 << 20,      True),
    }
    target, ceiling, split = table[gen]

    # Clamp the ceiling to actual hardware VMEM (with headroom) if queryable.
    try:
        cap = int(pltpu.get_tpu_info().vmem_capacity_bytes)
        ceiling = min(ceiling, max(8 << 20, (cap * 3) // 4))
    except Exception:
        pass
    return target, ceiling, split


# ----------------------------------------------------------------------------
# Forward wrapper
# ----------------------------------------------------------------------------
def att_forward(x, w=None, b=None, *, target_block_bytes=None):
    """x: (B, N, D) -> (B, D).

    w (1, D) / b (1,) are accepted for interface parity with nn.Linear(D, 1)
    but cannot affect the output: softmax over the size-1 projection dim is
    identically 1.0, so the module output is exactly X.sum(dim=1).
    """
    del w, b
    B, N, D = x.shape
    gen_target, vmem_ceiling, want_split = _generation_params()
    if target_block_bytes is None:
        target_block_bytes = gen_target

    tb, tn = _choose_tiles(B, N, D, x.dtype, target_block_bytes, want_split)
    grid = (B // tb, N // tn)

    itemsize = jnp.dtype(x.dtype).itemsize
    x_block_bytes = tb * tn * D * itemsize
    out_block_bytes = tb * D * itemsize

    if x.dtype == jnp.float32:
        kernel = _att_sum_kernel_direct
        scratch_shapes = []
        acc_bytes = 0
    else:
        kernel = _att_sum_kernel_acc
        scratch_shapes = [pltpu.VMEM((tb, D), jnp.float32)]
        acc_bytes = tb * D * 4

    # Double-buffered input + double-buffered output + scratch + slack,
    # clamped to a generation-appropriate ceiling.
    needed = 2 * x_block_bytes + 2 * out_block_bytes + acc_bytes + (8 << 20)
    vmem_limit = int(min(vmem_ceiling, max(32 << 20, needed)))

    return pl.pallas_call(
        kernel,
        out_shape=jax.ShapeDtypeStruct((B, D), x.dtype),
        grid_spec=pltpu.PrefetchScalarGridSpec(
            num_scalar_prefetch=0,
            grid=grid,
            in_specs=[pl.BlockSpec((tb, tn, D), lambda i, k: (i, k, 0))],
            out_specs=pl.BlockSpec((tb, D), lambda i, k: (i, 0)),
            scratch_shapes=scratch_shapes,
        ),
        compiler_params=pltpu.CompilerParams(
            dimension_semantics=("parallel", "arbitrary"),
            vmem_limit_bytes=vmem_limit,
        ),
    )(x)


def att_reference(x, w, b):
    # Pure-JAX reference matching the PyTorch forward exactly (including the
    # degenerate softmax over the size-1 last dim).
    scores = jnp.einsum("bnd,od->bno", x, w) + b          # (B, N, 1)
    alpha = jax.nn.softmax(scores, axis=-1)               # identically 1.0
    return jnp.sum(alpha * x, axis=1)                     # (B, D)


if __name__ == "__main__":
    key = jax.random.PRNGKey(0)
    kx, kw, kb, kx2 = jax.random.split(key, 4)

    # Small, deterministic shapes consistent with the module (in_size = D).
    B, N, D = 2, 8, 32
    x = jax.random.normal(kx, (B, N, D), dtype=jnp.float32)
    # nn.Linear(D, 1) parameter shapes (no effect on the output by construction).
    w = jax.random.normal(kw, (1, D), dtype=jnp.float32) * 0.05
    b = jax.random.normal(kb, (1,), dtype=jnp.float32) * 0.05

    out = jax.block_until_ready(att_forward(x, w, b))
    ref = att_reference(x, w, b)
    assert out.shape == (B, D)
    assert jnp.allclose(out, ref, atol=1e-5, rtol=1e-5), "mismatch vs reference"

    # Second small case: tiny block budget forces a multi-step reduction grid
    # (exercises the pl.when init / resident-output accumulation path).
    B2, N2, D2 = 16, 32, 128
    x2 = jax.random.normal(kx2, (B2, N2, D2), dtype=jnp.float32)
    out2 = jax.block_until_ready(
        att_forward(x2, target_block_bytes=8 * 8 * D2 * 4))
    ref2 = jnp.sum(x2, axis=1)
    assert out2.shape == (B2, D2)
    assert jnp.allclose(out2, ref2, atol=1e-4, rtol=1e-4), "mismatch (tiled case)"

    print("KERNEL_OK")
</pallas_src>

<mosaic_0001>
module attributes {stable_mosaic.version = 11 : i64} {
  func.func @_att_sum_kernel_direct(%arg0: i32, %arg1: i32, %arg2: memref<2x8x32xf32, #tpu.memory_space<vmem>>, %arg3: memref<2x32xf32, #tpu.memory_space<vmem>>) attributes {dimension_semantics = [#tpu.dimension_semantics<parallel>, #tpu.dimension_semantics<arbitrary>], iteration_bounds = array<i64: 1, 1>, scalar_prefetch = 0 : i64, scratch_operands = 0 : i64, tpu.core_type = #tpu.core_type<tc>, window_params = [{transform_indices = @transform_0, window_bounds = array<i64: 2, 8, 32>}, {transform_indices = @transform_1, window_bounds = array<i64: 2, 32>}]} {
    %c0_i32 = arith.constant 0 : i32
    %0 = arith.cmpi eq, %arg1, %c0_i32 : i32
    %1 = arith.extui %0 : i1 to i32
    %c0_i32_0 = arith.constant 0 : i32
    %2 = arith.cmpi ne, %1, %c0_i32_0 : i32
    scf.if %2 {
      %cst_7 = arith.constant 0.000000e+00 : f32
      %8 = vector.broadcast %cst_7 : f32 to vector<2x32xf32>
      %c0_8 = arith.constant 0 : index
      %c0_9 = arith.constant 0 : index
      %9 = vector.load %arg3[%c0_8, %c0_9] : memref<2x32xf32, #tpu.memory_space<vmem>>, vector<2x32xf32>
      tpu.vector_store %arg3[%c0_8, %c0_9], %8 {strides = array<i32>} : memref<2x32xf32, #tpu.memory_space<vmem>>, vector<2x32xf32>,
    } else {
    }
    %c0 = arith.constant 0 : index
    %c0_1 = arith.constant 0 : index
    %3 = vector.load %arg3[%c0, %c0_1] : memref<2x32xf32, #tpu.memory_space<vmem>>, vector<2x32xf32>
    %c0_2 = arith.constant 0 : index
    %c0_3 = arith.constant 0 : index
    %c0_4 = arith.constant 0 : index
    %4 = vector.load %arg2[%c0_2, %c0_3, %c0_4] : memref<2x8x32xf32, #tpu.memory_space<vmem>>, vector<2x8x32xf32>
    %cst = arith.constant dense<0.000000e+00> : vector<2x32xf32>
    %5 = vector.multi_reduction <add>, %4, %cst [1] : vector<2x8x32xf32> to vector<2x32xf32>
    %6 = arith.addf %3, %5 : vector<2x32xf32>
    %c0_5 = arith.constant 0 : index
    %c0_6 = arith.constant 0 : index
    %7 = vector.load %arg3[%c0_5, %c0_6] : memref<2x32xf32, #tpu.memory_space<vmem>>, vector<2x32xf32>
    tpu.vector_store %arg3[%c0_5, %c0_6], %6 {strides = array<i32>} : memref<2x32xf32, #tpu.memory_space<vmem>>, vector<2x32xf32>,
    return
  }
  func.func @transform_0(%arg0: i32, %arg1: i32) -> (i32, i32, i32) {
    %c0_i32 = arith.constant 0 : i32
    %c0_i32_0 = arith.constant 0 : i32
    return %arg0, %arg1, %c0_i32 : i32, i32, i32
  }
  func.func @transform_1(%arg0: i32, %arg1: i32) -> (i32, i32) {
    %c0_i32 = arith.constant 0 : i32
    %c0_i32_0 = arith.constant 0 : i32
    return %arg0, %c0_i32 : i32, i32
  }
}

</mosaic_0001>

<bundles_post_ra>
// kernel: tpu_custom_call.1
= control target key start
LH: loop header
LB: loop body
LE: loop exit
PB: predicated region body
PF: predicated region fallthrough
CT: control target
= control target key end

     0   :  { %6 = vsyncpa [#allocation3], 0  ;;  %s154_s0 = inlined_call_operand.hbm [shape: f32[2,8,32], index: 0, kind: input, shape index: {}]   ;;  %s155_s1 = inlined_call_operand.hbm [shape: f32[2,32], index: 1, kind: output, shape index: {}]  }
   0x1   :  { %7 = vsyncpa [#allocation4], 0  ;;  %s12_s8 = sshll.u32 %s154_s0, 4  ;;  %s131_s9 = smov [#allocation2]   ;;  %s13_s8 = int_to_ptr.hbm [resolvable:$true] %s12_s8 }
   0x2   :  { %s14_s10 = sshll.u32 %s131_s9, 4  ;;  %s132_s11 = smov 128   ;;  %s15_s10 = int_to_ptr.vmem [resolvable:$true] %s14_s10 }
   0x3   :  { %s133_s12 = smov 8  }
   0x4   :  { %20 = dma.hbm_to_vmem [thread:$0]  %s13_s8, 256, %s15_s10, [#allocation3], %s132_s11, %s132_s11, %s133_s12  }
   0x5   :  { %127 = dma.done.wait [#allocation3], 256  }
   0x6   :  { %128 = vsyncadd [#allocation3], 4294967040  ;;  %vm29_vm0 = vcmask 254976   ;;  %v134_v0 = vmov 0.0   ;;  %vm34_vm1 = vcmask 261120   ;;  %v32_v1 = vld [vmem:[#allocation2] sm:$0xff] }
   0x7   :  { %30 = vst.msk [vmem:[#allocation5] sm:$0x3] %vm29_vm0, %v134_v0  ;;  %v33_v2 = vld [vmem:[#allocation2 + $0x8] sm:$0xff]  ;;  %v35_v3 = vsel %vm34_vm1, %v32_v1, 0.0  ;;  %vm51_vm2 = vcmask 1041409   ;;  %s135_s0 = smov [#allocation5]  }
   0x8   :  { %v42_v4 = vsel %vm34_vm1, %v33_v2, 0.0  ;;  %v36_v5 = vrot.slane %v35_v3, 4  ;;  %s62_s13 = sshll.u32 %s135_s0, 4  ;;  %s64_s16 = sshll.u32 %s155_s1, 4  ;;  %s63_s13 = int_to_ptr.vmem [resolvable:$true] %s62_s13  ;;  %s65_s16 = int_to_ptr.hbm [resolvable:$true] %s64_s16 }
   0x9   :  { %v43_v6 = vrot.slane %v42_v4, 4 }
   0xa   :  { %v37_v7 = vadd.f32 %v36_v5, %v35_v3 }
   0xb   :  { %v44_v8 = vadd.f32 %v43_v6, %v42_v4 }
   0xc   :  { %v38_v9 = vrot.slane %v37_v7, 2 }
   0xd   :  { %v45_v10 = vrot.slane %v44_v8, 2 }
   0xe   :  { %v39_v11 = vadd.f32 %v38_v9, %v37_v7  ;;  %v31_v15 = vld [vmem:[#allocation5] sm:$0x3] }
   0xf   :  { %v46_v12 = vadd.f32 %v45_v10, %v44_v8 }
  0x10   :  { %v40_v13 = vrot.slane %v39_v11, 1 }
  0x11   :  { %v47_v14 = vrot.slane %v46_v12, 1 }
  0x12   :  { %v41_v16 = vadd.f32 %v40_v13, %v39_v11 }
  0x13   :  { %v48_v17 = vadd.f32 %v47_v14, %v46_v12 }
  0x15   :  { %v52_v18 = vsel %vm51_vm2, %v48_v17, %v41_v16 }
  0x16   :  { %v54_v19 = vadd.f32 %v52_v18, %v31_v15 }
  0x18   :  { %56 = vst.msk [vmem:[#allocation5] sm:$0x3] %vm29_vm0, %v54_v19 }
  0x19   :  { %67 = dma.vmem_to_hbm [thread:$0]  %s63_s13, 32, %s65_s16, [#allocation4]  }
  0x1a   :  { %129 = dma.done.wait [#allocation4], 32  }
  0x1b   :  { %130 = vsyncadd [#allocation4], 4294967264 }
  0x1c   :  { %72 = vsyncpa [#allocation3], 1 }
  0x1d   :  { %73 = vsyncpa [#allocation4], 1 }

</bundles_post_ra>
